<compile_context>
chip_gen: v5e
topology: v5e:2x2
jax: 0.10.0
libtpu: 0.0.40
codegen_flags: <defaults>
</compile_context>

<pallas_src>
import jax
import jax.numpy as jnp
from jax.experimental import pallas as pl
from jax.experimental.pallas import tpu as pltpu

LANES = 128          # vreg lane width
TILE_R = 512         # rows per grid step (512 x 128 f32 = 256 KiB / buffer)
PALLAS_MIN_N = 1024  # below this, let XLA fuse x * w + b


def _linear_kernel(w_ref, b_ref, x_ref, o_ref):
    # w_ref, b_ref: (1, 1) scalars in SMEM; x_ref, o_ref: (tile_r, 128) VMEM tiles.
    w = w_ref[0, 0]
    b = b_ref[0, 0]
    o_ref[...] = x_ref[...] * w + b


def _linear_pallas(x, weight, bias):
    """Lane-dense, tiled Pallas path.  x: (N, 1) -> (N, 1) float32."""
    n = x.shape[0]
    w = weight.reshape(1, 1).astype(jnp.float32)
    b = bias.reshape(1, 1).astype(jnp.float32)

    x_flat = x.reshape(-1).astype(jnp.float32)

    # View the flat vector as a (rows, 128) slab; pad N with zeros so the slab
    # is a whole number of (tile_r, 128) blocks.  Padded outputs are sliced off.
    rows = -(-n // LANES)
    if rows <= TILE_R:
        tile_r = rows                     # single full-array block (no (8,128)
        rows_pad = rows                   # divisibility requirement in that case)
    else:
        tile_r = TILE_R
        rows_pad = -(-rows // TILE_R) * TILE_R
    n_pad = rows_pad * LANES
    if n_pad != n:
        x_flat = jnp.pad(x_flat, (0, n_pad - n))
    x_slab = x_flat.reshape(rows_pad, LANES)

    grid = (rows_pad // tile_r,)
    out_slab = pl.pallas_call(
        _linear_kernel,
        out_shape=jax.ShapeDtypeStruct((rows_pad, LANES), jnp.float32),
        grid=grid,
        in_specs=[
            pl.BlockSpec(memory_space=pltpu.SMEM),              # weight scalar
            pl.BlockSpec(memory_space=pltpu.SMEM),              # bias scalar
            pl.BlockSpec((tile_r, LANES), lambda i: (i, 0)),    # x tile
        ],
        out_specs=pl.BlockSpec((tile_r, LANES), lambda i: (i, 0)),
        compiler_params=pltpu.CompilerParams(
            dimension_semantics=("parallel",),
        ),
    )(w, b, x_slab)

    return out_slab.reshape(-1)[:n].reshape(n, 1)


def linear_regression_forward(x, weight, bias, force_pallas=False):
    """x: (N, 1) float32, weight: (1, 1), bias: (1,) -> (N, 1) float32."""
    if x.shape[0] < PALLAS_MIN_N and not force_pallas:
        # Tiny batch: Pallas launch/grid overhead dominates -- fused XLA FMA.
        w = weight.reshape(1, 1).astype(jnp.float32)
        b = bias.reshape(1, 1).astype(jnp.float32)
        return x.astype(jnp.float32) * w[0, 0] + b[0, 0]
    return _linear_pallas(x, weight, bias)


if __name__ == "__main__":
    key = jax.random.PRNGKey(0)
    kx1, kx2, kw, kb = jax.random.split(key, 4)

    # nn.Linear(1, 1) parameters. PyTorch init: U(-1/sqrt(in), 1/sqrt(in)) = U(-1, 1).
    weight = jax.random.uniform(kw, (1, 1), jnp.float32, minval=-1.0, maxval=1.0)
    bias = jax.random.uniform(kb, (1,), jnp.float32, minval=-1.0, maxval=1.0)

    # 1) Tiny batch consistent with the module: (batch, in_features) = (8, 1).
    #    This exercises the small-N fallback path.
    x_small = jax.random.normal(kx1, (8, 1), jnp.float32)
    out_small = jax.block_until_ready(linear_regression_forward(x_small, weight, bias))
    ref_small = x_small @ weight.T + bias
    assert out_small.shape == (8, 1)
    assert jnp.allclose(out_small, ref_small, atol=1e-6), "small-batch mismatch"

    # 2) A modest batch (non-multiple of the slab size) through the Pallas kernel.
    n = 4096 + 37
    x_big = jax.random.normal(kx2, (n, 1), jnp.float32)
    out_big = jax.block_until_ready(
        linear_regression_forward(x_big, weight, bias, force_pallas=True)
    )
    ref_big = x_big @ weight.T + bias
    assert out_big.shape == (n, 1)
    assert jnp.allclose(out_big, ref_big, atol=1e-6), "pallas-path mismatch"

    print("KERNEL_OK")
</pallas_src>

<mosaic_0001>
module attributes {stable_mosaic.version = 11 : i64} {
  func.func @_linear_kernel(%arg0: i32, %arg1: memref<1x1xf32, #tpu.memory_space<smem>>, %arg2: memref<1x1xf32, #tpu.memory_space<smem>>, %arg3: memref<33x128xf32, #tpu.memory_space<vmem>>, %arg4: memref<33x128xf32, #tpu.memory_space<vmem>>) attributes {dimension_semantics = [#tpu.dimension_semantics<parallel>], iteration_bounds = array<i64: 1>, scalar_prefetch = 0 : i64, scratch_operands = 0 : i64, tpu.core_type = #tpu.core_type<tc>, window_params = [{transform_indices = @transform_0, window_bounds = array<i64: 1, 1>}, {transform_indices = @transform_1, window_bounds = array<i64: 1, 1>}, {transform_indices = @transform_2, window_bounds = array<i64: 33, 128>}, {transform_indices = @transform_3, window_bounds = array<i64: 33, 128>}]} {
    %c0 = arith.constant 0 : index
    %c0_0 = arith.constant 0 : index
    %0 = memref.load %arg1[%c0, %c0_0] : memref<1x1xf32, #tpu.memory_space<smem>>
    %c0_1 = arith.constant 0 : index
    %c0_2 = arith.constant 0 : index
    %1 = memref.load %arg2[%c0_1, %c0_2] : memref<1x1xf32, #tpu.memory_space<smem>>
    %c0_3 = arith.constant 0 : index
    %c0_4 = arith.constant 0 : index
    %2 = vector.load %arg3[%c0_3, %c0_4] : memref<33x128xf32, #tpu.memory_space<vmem>>, vector<33x128xf32>
    %3 = vector.broadcast %0 : f32 to vector<33x128xf32>
    %4 = arith.mulf %2, %3 : vector<33x128xf32>
    %5 = vector.broadcast %1 : f32 to vector<33x128xf32>
    %6 = arith.addf %4, %5 : vector<33x128xf32>
    %c0_5 = arith.constant 0 : index
    %c0_6 = arith.constant 0 : index
    %7 = vector.load %arg4[%c0_5, %c0_6] : memref<33x128xf32, #tpu.memory_space<vmem>>, vector<33x128xf32>
    tpu.vector_store %arg4[%c0_5, %c0_6], %6 {strides = array<i32>} : memref<33x128xf32, #tpu.memory_space<vmem>>, vector<33x128xf32>,
    return
  }
  func.func @transform_0(%arg0: i32) -> (i32, i32) {
    %c0_i32 = arith.constant 0 : i32
    %c0_i32_0 = arith.constant 0 : i32
    %c0_i32_1 = arith.constant 0 : i32
    return %c0_i32, %c0_i32_0 : i32, i32
  }
  func.func @transform_1(%arg0: i32) -> (i32, i32) {
    %c0_i32 = arith.constant 0 : i32
    %c0_i32_0 = arith.constant 0 : i32
    %c0_i32_1 = arith.constant 0 : i32
    return %c0_i32, %c0_i32_0 : i32, i32
  }
  func.func @transform_2(%arg0: i32) -> (i32, i32) {
    %c0_i32 = arith.constant 0 : i32
    %c0_i32_0 = arith.constant 0 : i32
    return %arg0, %c0_i32 : i32, i32
  }
  func.func @transform_3(%arg0: i32) -> (i32, i32) {
    %c0_i32 = arith.constant 0 : i32
    %c0_i32_0 = arith.constant 0 : i32
    return %arg0, %c0_i32 : i32, i32
  }
}

</mosaic_0001>

<bundles_post_ra>
// kernel: tpu_custom_call.1
= control target key start
LH: loop header
LB: loop body
LE: loop exit
PB: predicated region body
PF: predicated region fallthrough
CT: control target
= control target key end

     0   :  { %10 = vsyncpa [#allocation5], 0  ;;  %s174_s0 = inlined_call_operand.<no memory space> [shape: f32[1,1], index: 0, kind: input, shape index: {}]   ;;  %s175_s1 = inlined_call_operand.<no memory space> [shape: f32[1,1], index: 1, kind: input, shape index: {}]   ;;  %s176_s2 = inlined_call_operand.hbm [shape: f32[33,128], index: 2, kind: input, shape index: {}]   ;;  %s177_s3 = inlined_call_operand.hbm [shape: f32[33,128], index: 3, kind: output, shape index: {}]  }
   0x1   :  { %11 = vsyncpa [#allocation6], 0  ;;  %s20_s14 = sshll.u32 %s176_s2, 4  ;;  %s132_s15 = smov [#allocation4]   ;;  %s21_s14 = int_to_ptr.hbm [resolvable:$true] %s20_s14 }
   0x2   :  { %s22_s16 = sshll.u32 %s132_s15, 4  ;;  %s133_s17 = smov 128   ;;  %s23_s16 = int_to_ptr.vmem [resolvable:$true] %s22_s16 }
   0x3   :  { %s134_s18 = smov 8  }
   0x4   :  { %28 = dma.hbm_to_vmem [thread:$0]  %s21_s14, 640, %s23_s16, [#allocation5], %s133_s17, %s133_s17, %s134_s18  }
   0x5   :  { %128 = dma.done.wait [#allocation5], 640  }
   0x6   :  { %129 = vsyncadd [#allocation5], 4294966656  ;;  %v40_v0 = vstv %s174_s0  ;;  %v35_v1 = vld [vmem:[#allocation4] sm:$0xff]  ;;  %v46_v2 = vstv %s175_s1  ;;  %v36_v3 = vld [vmem:[#allocation4 + $0x8] sm:$0xff]  ;;  %s135_s2 = smov [#allocation7]   ;;  %s63_s25 = sshll.u32 %s177_s3, 4  ;;  %s64_s25 = int_to_ptr.hbm [resolvable:$true] %s63_s25 }
   0x7   :  { %v37_v4 = vld [vmem:[#allocation4 + $0x10] sm:$0xff]  ;;  %v41_v5 = vmul.f32 %v40_v0, %v35_v1  ;;  %v42_v6 = vmul.f32 %v40_v0, %v36_v3  ;;  %v38_v8 = vld [vmem:[#allocation4 + $0x18] sm:$0xff]  ;;  %v39_v9 = vld [vmem:[#allocation4 + $0x20] sm:$0x1]  ;;  %s61_s0 = sshll.u32 %s135_s2, 4  ;;  %s62_s0 = int_to_ptr.vmem [resolvable:$true] %s61_s0 }
   0x8   :  { %v43_v7 = vmul.f32 %v40_v0, %v37_v4  ;;  %v44_v10 = vmul.f32 %v40_v0, %v38_v8  ;;  %v45_v11 = vmul.f32 %v40_v0, %v39_v9 }
   0x9   :  { %v47_v12 = vadd.f32 %v46_v2, %v41_v5  ;;  %v48_v13 = vadd.f32 %v46_v2, %v42_v6 }
   0xa   :  { %v49_v14 = vadd.f32 %v46_v2, %v43_v7  ;;  %v50_v15 = vadd.f32 %v46_v2, %v44_v10  ;;  %v51_v16 = vadd.f32 %v46_v2, %v45_v11 }
   0xb   :  { %52 = vst [vmem:[#allocation7] sm:$0xff] %v47_v12 }
   0xc   :  { %53 = vst [vmem:[#allocation7 + $0x8] sm:$0xff] %v48_v13 }
   0xd   :  { %54 = vst [vmem:[#allocation7 + $0x10] sm:$0xff] %v49_v14 }
   0xe   :  { %55 = vst [vmem:[#allocation7 + $0x18] sm:$0xff] %v50_v15 }
   0xf   :  { %56 = vst [vmem:[#allocation7 + $0x20] sm:$0x1] %v51_v16 }
  0x10   :  { %69 = dma.vmem_to_hbm [thread:$0]  %s62_s0, 640, %s64_s25, [#allocation6], %s133_s17, %s133_s17, %s134_s18  }
  0x11   :  { %130 = dma.done.wait [#allocation6], 640  }
  0x12   :  { %131 = vsyncadd [#allocation6], 4294966656 }
  0x13   :  { %74 = vsyncpa [#allocation5], 1 }
  0x14   :  { %75 = vsyncpa [#allocation6], 1 }

</bundles_post_ra>
